<compile_context>
chip_gen: v5e
topology: v5e:2x2
jax: 0.10.0
libtpu: 0.0.40
codegen_flags: <defaults>
</compile_context>

<pallas_src>
import jax
import jax.numpy as jnp
from jax.experimental import pallas as pl
from jax.experimental.pallas import tpu as pltpu

H1, H2, OUT = 400, 300, 1           # logical (PyTorch) layer widths
H1P, H2P, OUTP = 512, 384, 128      # lane-padded widths used inside the kernel


def _round_up(x, m):
    return (x + m - 1) // m * m


def critic_kernel(s_ref, a_ref, w1s_ref, w1a_ref, b1_ref,
                  w2_ref, b2_ref, w3_ref, b3_ref, o_ref):
    # Layer 1: concat folded into two matmuls on the row-split weight.
    s = s_ref[...].astype(jnp.bfloat16)
    a = a_ref[...].astype(jnp.bfloat16)
    h1 = (jnp.dot(s, w1s_ref[...], preferred_element_type=jnp.float32)
          + jnp.dot(a, w1a_ref[...], preferred_element_type=jnp.float32)
          + b1_ref[...])
    h1 = jnp.maximum(h1, 0.0)                                    # ReLU (f32)

    # Layer 2
    h2 = jnp.dot(h1.astype(jnp.bfloat16), w2_ref[...],
                 preferred_element_type=jnp.float32) + b2_ref[...]
    h2 = jnp.maximum(h2, 0.0)                                    # ReLU (f32)

    # Layer 3: lane-padded (N=128) matmul for MXU friendliness, but only the
    # real Q column is written back (masked (TB,1) store; tiny vs HBM savings).
    q = jnp.dot(h2.astype(jnp.bfloat16), w3_ref[...],
                preferred_element_type=jnp.float32) + b3_ref[...]
    o_ref[...] = q[:, :OUT].astype(o_ref.dtype)


def init_critic_params(key, state_dim, action_dim):
    """PyTorch-style uniform(-1/sqrt(fan_in), 1/sqrt(fan_in)) init, f32, unpadded."""
    dims = [(state_dim + action_dim, H1), (H1, H2), (H2, OUT)]
    params = []
    for (fan_in, fan_out) in dims:
        key, kw, kb = jax.random.split(key, 3)
        bound = 1.0 / jnp.sqrt(fan_in)
        w = jax.random.uniform(kw, (fan_in, fan_out), jnp.float32, -bound, bound)
        b = jax.random.uniform(kb, (1, fan_out), jnp.float32, -bound, bound)
        params += [w, b]
    return tuple(params)


def pack_critic_params(params, state_dim, action_dim):
    """Zero-pad to lane multiples, split w1 by rows, cast weights to bf16."""
    w1, b1, w2, b2, w3, b3 = params

    def pad_to(x, shape):
        return jnp.pad(x, [(0, t - s) for s, t in zip(x.shape, shape)])

    w1p = pad_to(w1, (state_dim + action_dim, H1P)).astype(jnp.bfloat16)
    w1s, w1a = w1p[:state_dim], w1p[state_dim:]
    b1p = pad_to(b1, (1, H1P)).astype(jnp.float32)   # padded bias entries == 0
    w2p = pad_to(w2, (H1P, H2P)).astype(jnp.bfloat16)
    b2p = pad_to(b2, (1, H2P)).astype(jnp.float32)
    w3p = pad_to(w3, (H2P, OUTP)).astype(jnp.bfloat16)
    b3p = pad_to(b3, (1, OUTP)).astype(jnp.float32)
    return (w1s, w1a, b1p, w2p, b2p, w3p, b3p)


def _choose_batch_tile(B):
    # B < 512: one resident block, grid=1, no padding (splitting would only add
    # per-step overhead and a second weight DMA per core).
    # B >= 512: at least 2 grid steps so both v7x TensorCores get work, with the
    # tile capped at 1024 rows (~5 MiB total VMEM footprint incl. f32 h1/h2).
    if B < 512:
        return B
    return min(1024, _round_up((B + 1) // 2, 8))


def critic_forward(state, action, packed):
    """state: (B, state_dim), action: (B, action_dim) -> (B, 1) f32 Q-values."""
    w1s, w1a, b1, w2, b2, w3, b3 = packed
    B, state_dim = state.shape
    action_dim = action.shape[1]

    TB = _choose_batch_tile(B)
    Bp = _round_up(B, TB)
    if Bp != B:
        state = jnp.pad(state, ((0, Bp - B), (0, 0)))
        action = jnp.pad(action, ((0, Bp - B), (0, 0)))

    flops = 2 * B * ((state_dim + action_dim) * H1 + H1 * H2 + H2 * OUT)
    bytes_accessed = (
        (w1s.size + w1a.size + w2.size + w3.size) * 2      # bf16 weights
        + (b1.size + b2.size + b3.size) * 4                 # f32 biases
        + (state.size + action.size) * 4                    # inputs
        + Bp * OUT * 4)                                      # (Bp, 1) output

    out = pl.pallas_call(
        critic_kernel,
        out_shape=jax.ShapeDtypeStruct((Bp, OUT), jnp.float32),
        grid=(Bp // TB,),
        in_specs=[
            pl.BlockSpec((TB, state_dim), lambda i: (i, 0)),
            pl.BlockSpec((TB, action_dim), lambda i: (i, 0)),
            pl.BlockSpec((state_dim, H1P), lambda i: (0, 0)),
            pl.BlockSpec((action_dim, H1P), lambda i: (0, 0)),
            pl.BlockSpec((1, H1P), lambda i: (0, 0)),
            pl.BlockSpec((H1P, H2P), lambda i: (0, 0)),
            pl.BlockSpec((1, H2P), lambda i: (0, 0)),
            pl.BlockSpec((H2P, OUTP), lambda i: (0, 0)),
            pl.BlockSpec((1, OUTP), lambda i: (0, 0)),
        ],
        out_specs=pl.BlockSpec((TB, OUT), lambda i: (i, 0)),
        compiler_params=pltpu.CompilerParams(
            dimension_semantics=("parallel",),
            vmem_limit_bytes=32 * 1024 * 1024),
        cost_estimate=pl.CostEstimate(
            flops=flops, transcendentals=0, bytes_accessed=bytes_accessed),
    )(state, action, w1s, w1a, b1, w2, b2, w3, b3)

    # Only slice when batch padding was actually added (no readback otherwise).
    return out if Bp == B else out[:B]


def critic_reference(state, action, params):
    """Pure-JAX f32 reference matching the PyTorch module."""
    w1, b1, w2, b2, w3, b3 = params
    x = jnp.concatenate([state, action], axis=1)
    h1 = jnp.maximum(x @ w1 + b1, 0.0)
    h2 = jnp.maximum(h1 @ w2 + b2, 0.0)
    return h2 @ w3 + b3


if __name__ == "__main__":
    key = jax.random.PRNGKey(0)
    batch, state_dim, action_dim = 2, 8, 4

    k_params, k_state, k_action = jax.random.split(key, 3)
    params = init_critic_params(k_params, state_dim, action_dim)
    packed = pack_critic_params(params, state_dim, action_dim)
    state = jax.random.normal(k_state, (batch, state_dim), jnp.float32)
    action = jax.random.normal(k_action, (batch, action_dim), jnp.float32)

    q = critic_forward(state, action, packed)
    q = jax.block_until_ready(q)

    q_ref = critic_reference(state, action, params)
    assert q.shape == (batch, 1)
    # bf16 matmul operands with f32 accumulation -> slightly looser tolerance
    # than a pure-f32 path, still tight relative to Q magnitudes.
    assert jnp.allclose(q, q_ref, atol=2e-2, rtol=2e-2), (q, q_ref)

    print("KERNEL_OK")
</pallas_src>

<mosaic_0001>
module attributes {stable_mosaic.version = 11 : i64} {
  func.func @critic_kernel(%arg0: i32, %arg1: memref<2x8xf32, #tpu.memory_space<vmem>>, %arg2: memref<2x4xf32, #tpu.memory_space<vmem>>, %arg3: memref<8x512xbf16, #tpu.memory_space<vmem>>, %arg4: memref<4x512xbf16, #tpu.memory_space<vmem>>, %arg5: memref<1x512xf32, #tpu.memory_space<vmem>>, %arg6: memref<512x384xbf16, #tpu.memory_space<vmem>>, %arg7: memref<1x384xf32, #tpu.memory_space<vmem>>, %arg8: memref<384x128xbf16, #tpu.memory_space<vmem>>, %arg9: memref<1x128xf32, #tpu.memory_space<vmem>>, %arg10: memref<2x1xf32, #tpu.memory_space<vmem>>) attributes {dimension_semantics = [#tpu.dimension_semantics<parallel>], iteration_bounds = array<i64: 1>, scalar_prefetch = 0 : i64, scratch_operands = 0 : i64, tpu.core_type = #tpu.core_type<tc>, window_params = [{transform_indices = @transform_0, window_bounds = array<i64: 2, 8>}, {transform_indices = @transform_1, window_bounds = array<i64: 2, 4>}, {pipeline_mode = #tpu.pipeline_mode<synchronous>, transform_indices = @transform_2, window_bounds = array<i64: 8, 512>}, {pipeline_mode = #tpu.pipeline_mode<synchronous>, transform_indices = @transform_3, window_bounds = array<i64: 4, 512>}, {pipeline_mode = #tpu.pipeline_mode<synchronous>, transform_indices = @transform_4, window_bounds = array<i64: 1, 512>}, {pipeline_mode = #tpu.pipeline_mode<synchronous>, transform_indices = @transform_5, window_bounds = array<i64: 512, 384>}, {pipeline_mode = #tpu.pipeline_mode<synchronous>, transform_indices = @transform_6, window_bounds = array<i64: 1, 384>}, {pipeline_mode = #tpu.pipeline_mode<synchronous>, transform_indices = @transform_7, window_bounds = array<i64: 384, 128>}, {pipeline_mode = #tpu.pipeline_mode<synchronous>, transform_indices = @transform_8, window_bounds = array<i64: 1, 128>}, {transform_indices = @transform_9, window_bounds = array<i64: 2, 1>}]} {
    %c0 = arith.constant 0 : index
    %c0_0 = arith.constant 0 : index
    %0 = vector.load %arg1[%c0, %c0_0] : memref<2x8xf32, #tpu.memory_space<vmem>>, vector<2x8xf32>
    %1 = arith.truncf %0 : vector<2x8xf32> to vector<2x8xbf16>
    %c0_1 = arith.constant 0 : index
    %c0_2 = arith.constant 0 : index
    %2 = vector.load %arg2[%c0_1, %c0_2] : memref<2x4xf32, #tpu.memory_space<vmem>>, vector<2x4xf32>
    %3 = arith.truncf %2 : vector<2x4xf32> to vector<2x4xbf16>
    %c0_3 = arith.constant 0 : index
    %c0_4 = arith.constant 0 : index
    %4 = vector.load %arg3[%c0_3, %c0_4] : memref<8x512xbf16, #tpu.memory_space<vmem>>, vector<8x512xbf16>
    %cst = arith.constant dense<0.000000e+00> : vector<2x512xf32>
    %5 = tpu.matmul %1, %4, %cst {dimension_numbers = #tpu.dot_dimension_numbers<[1], [0], [0], [1], [0, 0, 1, 1], [], []>} : vector<2x8xbf16>, vector<8x512xbf16>, vector<2x512xf32> -> vector<2x512xf32>
    %c0_5 = arith.constant 0 : index
    %c0_6 = arith.constant 0 : index
    %6 = vector.load %arg4[%c0_5, %c0_6] : memref<4x512xbf16, #tpu.memory_space<vmem>>, vector<4x512xbf16>
    %cst_7 = arith.constant dense<0.000000e+00> : vector<2x512xf32>
    %7 = tpu.matmul %3, %6, %cst_7 {dimension_numbers = #tpu.dot_dimension_numbers<[1], [0], [0], [1], [0, 0, 1, 1], [], []>} : vector<2x4xbf16>, vector<4x512xbf16>, vector<2x512xf32> -> vector<2x512xf32>
    %8 = arith.addf %5, %7 : vector<2x512xf32>
    %c0_8 = arith.constant 0 : index
    %c0_9 = arith.constant 0 : index
    %9 = vector.load %arg5[%c0_8, %c0_9] : memref<1x512xf32, #tpu.memory_space<vmem>>, vector<1x512xf32>
    %10 = vector.broadcast %9 : vector<1x512xf32> to vector<2x512xf32>
    %11 = arith.addf %8, %10 : vector<2x512xf32>
    %cst_10 = arith.constant 0.000000e+00 : f32
    %12 = vector.broadcast %cst_10 : f32 to vector<2x512xf32>
    %13 = arith.maximumf %11, %12 : vector<2x512xf32>
    %14 = arith.truncf %13 : vector<2x512xf32> to vector<2x512xbf16>
    %c0_11 = arith.constant 0 : index
    %c0_12 = arith.constant 0 : index
    %15 = vector.load %arg6[%c0_11, %c0_12] : memref<512x384xbf16, #tpu.memory_space<vmem>>, vector<512x384xbf16>
    %cst_13 = arith.constant dense<0.000000e+00> : vector<2x384xf32>
    %16 = tpu.matmul %14, %15, %cst_13 {dimension_numbers = #tpu.dot_dimension_numbers<[1], [0], [0], [1], [0, 0, 1, 1], [], []>} : vector<2x512xbf16>, vector<512x384xbf16>, vector<2x384xf32> -> vector<2x384xf32>
    %c0_14 = arith.constant 0 : index
    %c0_15 = arith.constant 0 : index
    %17 = vector.load %arg7[%c0_14, %c0_15] : memref<1x384xf32, #tpu.memory_space<vmem>>, vector<1x384xf32>
    %18 = vector.broadcast %17 : vector<1x384xf32> to vector<2x384xf32>
    %19 = arith.addf %16, %18 : vector<2x384xf32>
    %cst_16 = arith.constant 0.000000e+00 : f32
    %20 = vector.broadcast %cst_16 : f32 to vector<2x384xf32>
    %21 = arith.maximumf %19, %20 : vector<2x384xf32>
    %22 = arith.truncf %21 : vector<2x384xf32> to vector<2x384xbf16>
    %c0_17 = arith.constant 0 : index
    %c0_18 = arith.constant 0 : index
    %23 = vector.load %arg8[%c0_17, %c0_18] : memref<384x128xbf16, #tpu.memory_space<vmem>>, vector<384x128xbf16>
    %cst_19 = arith.constant dense<0.000000e+00> : vector<2x128xf32>
    %24 = tpu.matmul %22, %23, %cst_19 {dimension_numbers = #tpu.dot_dimension_numbers<[1], [0], [0], [1], [0, 0, 1, 1], [], []>} : vector<2x384xbf16>, vector<384x128xbf16>, vector<2x128xf32> -> vector<2x128xf32>
    %c0_20 = arith.constant 0 : index
    %c0_21 = arith.constant 0 : index
    %25 = vector.load %arg9[%c0_20, %c0_21] : memref<1x128xf32, #tpu.memory_space<vmem>>, vector<1x128xf32>
    %26 = vector.broadcast %25 : vector<1x128xf32> to vector<2x128xf32>
    %27 = arith.addf %24, %26 : vector<2x128xf32>
    %28 = vector.extract_strided_slice %27 {offsets = [0, 0], sizes = [2, 1], strides = [1, 1]} : vector<2x128xf32> to vector<2x1xf32>
    %c0_22 = arith.constant 0 : index
    %c0_23 = arith.constant 0 : index
    %29 = vector.load %arg10[%c0_22, %c0_23] : memref<2x1xf32, #tpu.memory_space<vmem>>, vector<2x1xf32>
    tpu.vector_store %arg10[%c0_22, %c0_23], %28 {strides = array<i32>} : memref<2x1xf32, #tpu.memory_space<vmem>>, vector<2x1xf32>,
    return
  }
  func.func @transform_0(%arg0: i32) -> (i32, i32) {
    %c0_i32 = arith.constant 0 : i32
    %c0_i32_0 = arith.constant 0 : i32
    return %arg0, %c0_i32 : i32, i32
  }
  func.func @transform_1(%arg0: i32) -> (i32, i32) {
    %c0_i32 = arith.constant 0 : i32
    %c0_i32_0 = arith.constant 0 : i32
    return %arg0, %c0_i32 : i32, i32
  }
  func.func @transform_2(%arg0: i32) -> (i32, i32) {
    %c0_i32 = arith.constant 0 : i32
    %c0_i32_0 = arith.constant 0 : i32
    %c0_i32_1 = arith.constant 0 : i32
    return %c0_i32, %c0_i32_0 : i32, i32
  }
  func.func @transform_3(%arg0: i32) -> (i32, i32) {
    %c0_i32 = arith.constant 0 : i32
    %c0_i32_0 = arith.constant 0 : i32
    %c0_i32_1 = arith.constant 0 : i32
    return %c0_i32, %c0_i32_0 : i32, i32
  }
  func.func @transform_4(%arg0: i32) -> (i32, i32) {
    %c0_i32 = arith.constant 0 : i32
    %c0_i32_0 = arith.constant 0 : i32
    %c0_i32_1 = arith.constant 0 : i32
    return %c0_i32, %c0_i32_0 : i32, i32
  }
  func.func @transform_5(%arg0: i32) -> (i32, i32) {
    %c0_i32 = arith.constant 0 : i32
    %c0_i32_0 = arith.constant 0 : i32
    %c0_i32_1 = arith.constant 0 : i32
    return %c0_i32, %c0_i32_0 : i32, i32
  }
  func.func @transform_6(%arg0: i32) -> (i32, i32) {
    %c0_i32 = arith.constant 0 : i32
    %c0_i32_0 = arith.constant 0 : i32
    %c0_i32_1 = arith.constant 0 : i32
    return %c0_i32, %c0_i32_0 : i32, i32
  }
  func.func @transform_7(%arg0: i32) -> (i32, i32) {
    %c0_i32 = arith.constant 0 : i32
    %c0_i32_0 = arith.constant 0 : i32
    %c0_i32_1 = arith.constant 0 : i32
    return %c0_i32, %c0_i32_0 : i32, i32
  }
  func.func @transform_8(%arg0: i32) -> (i32, i32) {
    %c0_i32 = arith.constant 0 : i32
    %c0_i32_0 = arith.constant 0 : i32
    %c0_i32_1 = arith.constant 0 : i32
    return %c0_i32, %c0_i32_0 : i32, i32
  }
  func.func @transform_9(%arg0: i32) -> (i32, i32) {
    %c0_i32 = arith.constant 0 : i32
    %c0_i32_0 = arith.constant 0 : i32
    return %arg0, %c0_i32 : i32, i32
  }
}

</mosaic_0001>

<bundles_post_ra>
// kernel: tpu_custom_call.1
= control target key start
LH: loop header
LB: loop body
LE: loop exit
PB: predicated region body
PF: predicated region fallthrough
CT: control target
= control target key end

     0   :  { %14 = vsyncpa [#allocation3], 0  ;;  %s2302_s0 = inlined_call_operand.hbm [shape: f32[2,8], index: 0, kind: input, shape index: {}]   ;;  %s2303_s1 = inlined_call_operand.hbm [shape: f32[2,4], index: 1, kind: input, shape index: {}]   ;;  %s2304_s2 = inlined_call_operand.hbm [shape: bf16[8,512], index: 2, kind: input, shape index: {}]   ;;  %s2305_s3 = inlined_call_operand.hbm [shape: bf16[4,512], index: 3, kind: input, shape index: {}]   ;;  %s2306_s4 = inlined_call_operand.hbm [shape: f32[1,512], index: 4, kind: input, shape index: {}]   ;;  %s2307_s5 = inlined_call_operand.hbm [shape: bf16[512,384], index: 5, kind: input, shape index: {}]   ;;  %s2308_s6 = inlined_call_operand.vmem [shape: f32[1,384], index: 6, kind: input, shape index: {}]   ;;  %s2309_s7 = inlined_call_operand.hbm [shape: bf16[384,128], index: 7, kind: input, shape index: {}]   ;;  %s2310_s8 = inlined_call_operand.vmem [shape: f32[1,128], index: 8, kind: input, shape index: {}]   ;;  %s2311_s9 = inlined_call_operand.vmem [shape: f32[2,1], index: 9, kind: output, shape index: {}]  }
   0x1   :  { %15 = vsyncpa [#allocation5], 0 }
   0x2   :  { %16 = vsyncpa [#allocation8], 0  ;;  %s34_s11 = sshll.u32 %s2303_s1, 4  ;;  %s35_s11 = int_to_ptr.hbm [resolvable:$true] %s34_s11 }
   0x3   :  { %17 = vsyncpa [#allocation11], 0  ;;  %s2162_s12 = smov [#allocation4]   ;;  %s56_s16 = sshll.u32 %s2305_s3, 4  ;;  %s57_s16 = int_to_ptr.hbm [resolvable:$true] %s56_s16 }
   0x4   :  { %s36_s13 = sshll.u32 %s2162_s12, 4  ;;  %s2163_s17 = smov [#allocation7]   ;;  %s37_s13 = int_to_ptr.vmem [resolvable:$true] %s36_s13 }
   0x5   :  { %39 = dma.hbm_to_vmem [thread:$0]  %s35_s11, 32, %s37_s13, [#allocation5]  }
   0x6   :  { %s58_s18 = sshll.u32 %s2163_s17, 4  ;;  %s77_s21 = sshll.u32 %s2307_s5, 4  ;;  %s59_s18 = int_to_ptr.vmem [resolvable:$true] %s58_s18  ;;  %s78_s21 = int_to_ptr.hbm [resolvable:$true] %s77_s21 }
   0x7   :  { %61 = dma.hbm_to_vmem [thread:$0]  %s57_s16, 128, %s59_s18, [#allocation8]  }
   0x8   :  { %s2164_s1 = smov [#allocation10]   ;;  %s23_s25 = sshll.u32 %s2302_s0, 4  ;;  %s24_s25 = int_to_ptr.hbm [resolvable:$true] %s23_s25 }
   0x9   :  { %s79_s22 = sshll.u32 %s2164_s1, 4  ;;  %s2165_s26 = smov 192   ;;  %s80_s22 = int_to_ptr.vmem [resolvable:$true] %s79_s22 }
   0xa   :  { %s2166_s3 = smov 12   ;;  %s2167_s27 = smov [#allocation2]  }
   0xb   :  { %85 = dma.hbm_to_vmem [thread:$0]  %s78_s21, 12288, %s80_s22, [#allocation11], %s2165_s26, %s2165_s26, %s2166_s3  }
   0xc   :  { %s25_s28 = sshll.u32 %s2167_s27, 4  ;;  %s45_s5 = sshll.u32 %s2304_s2, 4  ;;  %s26_s28 = int_to_ptr.vmem [resolvable:$true] %s25_s28  ;;  %s46_s5 = int_to_ptr.hbm [resolvable:$true] %s45_s5 }
   0xd   :  { %28 = dma.hbm_to_vmem [thread:$0]  %s24_s25, 32, %s26_s28, [#allocation3]  }
   0xe   :  { %s67_s12 = sshll.u32 %s2306_s4, 4  ;;  %s2168_s13 = smov [#allocation6]   ;;  %s68_s12 = int_to_ptr.hbm [resolvable:$true] %s67_s12 }
   0xf   :  { %s47_s14 = sshll.u32 %s2168_s13, 4  ;;  %s2169_s0 = smov [#allocation9]   ;;  %s48_s14 = int_to_ptr.vmem [resolvable:$true] %s47_s14 }
  0x10   :  { %50 = dma.hbm_to_vmem [thread:$0]  %s46_s5, 256, %s48_s14, [#allocation5]  }
  0x11   :  { %s69_s15 = sshll.u32 %s2169_s0, 4  ;;  %s92_s18 = sshll.u32 %s2309_s7, 4  ;;  %s70_s15 = int_to_ptr.vmem [resolvable:$true] %s69_s15  ;;  %s93_s18 = int_to_ptr.hbm [resolvable:$true] %s92_s18 }
  0x12   :  { %72 = dma.hbm_to_vmem [thread:$0]  %s68_s12, 64, %s70_s15, [#allocation8]  }
  0x13   :  { %s2170_s2 = smov [#allocation12]   ;;  %s2171_s20 = smov 64  }
  0x14   :  { %s94_s19 = sshll.u32 %s2170_s2, 4  ;;  %s2172_s21 = smov 4   ;;  %s95_s19 = int_to_ptr.vmem [resolvable:$true] %s94_s19 }
  0x15   :  { %100 = dma.hbm_to_vmem [thread:$0]  %s93_s18, 3072, %s95_s19, [#allocation11], %s2171_s20, %s2171_s20, %s2172_s21  }
  0x16   :  { %2154 = dma.done.wait [#allocation3], 32  }
  0x17   :  { %2155 = vsyncadd [#allocation3], 4294967264 }
  0x18   :  { %2156 = dma.done.wait [#allocation5], 288  }
  0x19   :  { %2157 = vsyncadd [#allocation5], 4294967008 }
  0x1a   :  { %2158 = dma.done.wait [#allocation8], 192  }
  0x1b   :  { %2159 = vsyncadd [#allocation8], 4294967104 }
  0x1c   :  { %2160 = dma.done.wait [#allocation11], 15360  }
  0x1d   :  { %2161 = vsyncadd [#allocation11], 4294951936  ;;  %v138_v0 = vld [vmem:[#allocation7] sm:$0xff]  ;;  %v136_v1 = vld [vmem:[#allocation6] sm:$0xff]  ;;  %vm224_vm0 = vcmask 1043456   ;;  %vm149_vm1 = vcmask 1041408  }
  0x1e   :  { %140 = vst [vmem:[#allocation1] ss:$4 sm:$0xff] %v138_v0  ;;  %v212_v2 = vunpack.c.l.b16 %v136_v1  ;;  %v213_v3 = vunpack.c.h.b16 %v136_v1  ;;  %v137_v4 = vld [vmem:[#allocation6 + $0x8] sm:$0xff]  ;;  %v132_v5 = vld [vmem:[#allocation2] sm:$0x3]  ;;  %vm220_vm2 = vcmask 64512  }
  0x1f   :  { %v214_v6 = vunpack.c.l.b16 %v137_v4  ;;  %v215_v9 = vunpack.c.h.b16 %v137_v4  ;;  %v2245_v11 = vpack.c.bf16 %v132_v5, %v132_v5  ;;  %v134_v13 = vld [vmem:[#allocation4] sm:$0x3]  ;;  %vm145_vm3 = vcmask 31744   ;;  %v1460_v27 = vld [vmem:[#allocation10 + $0xa8] sm:$0xf] }
  0x20   :  { %v216_v7 = vpack.c.b16 %v212_v2, %v212_v2  ;;  %v217_v8 = vpack.c.b16 %v213_v3, %v213_v3  ;;  %v2250_v21 = vpack.c.bf16 %v134_v13, %v134_v13  ;;  %v1876_v28 = vld [vmem:[#allocation10 + $0xb0] sm:$0xf0]  ;;  %v1448_v29 = vld [vmem:[#allocation10 + $0x90] sm:$0xf]  ;;  %v1873_v31 = vld [vmem:[#allocation10 + $0x98] sm:$0xf0] }
  0x21   :  { %v218_v12 = vpack.c.b16 %v214_v6, %v214_v6  ;;  %v219_v15 = vpack.c.b16 %v215_v9, %v215_v9  ;;  %v1461_v30 = vor.u32 %v1876_v28, %v1460_v27  ;;  %v1556_v32 = vld [vmem:[#allocation10 + $0x168] sm:$0xf]  ;;  %v1900_v33 = vld [vmem:[#allocation10 + $0x170] sm:$0xf0]  ;;  %v1449_v34 = vor.u32 %v1873_v31, %v1448_v29  ;;  %v1544_v36 = vld [vmem:[#allocation10 + $0x150] sm:$0xf] }
  0x22   :  { %v226_v10 = vsel %vm224_vm0, %v216_v7, 0  ;;  %v229_v14 = vsel %vm224_vm0, %v217_v8, 0  ;;  %v1557_v35 = vor.u32 %v1900_v33, %v1556_v32  ;;  %v1897_v37 = vld [vmem:[#allocation10 + $0x158] sm:$0xf0]  ;;  %v1436_v38 = vld [vmem:[#allocation10 + $0x78] sm:$0xf] }
  0x23   :  { %244 = vmatpush.bf16.msra.mxu0 %v226_v10  ;;  %v232_v22 = vsel %vm224_vm0, %v218_v12, 0  ;;  %v235_v26 = vsel %vm224_vm0, %v219_v15, 0  ;;  %v1870_v39 = vld [vmem:[#allocation10 + $0x80] sm:$0xf0]  ;;  %v1652_v40 = vld [vmem:[#allocation10 + $0x228] sm:$0xf]  ;;  %v1545_v41 = vor.u32 %v1897_v37, %v1544_v36 }
  0x24   :  { %v1924_v42 = vld [vmem:[#allocation10 + $0x230] sm:$0xf0]  ;;  %v1532_v44 = vld [vmem:[#allocation10 + $0x138] sm:$0xf]  ;;  %v1894_v45 = vld [vmem:[#allocation10 + $0x140] sm:$0xf0]  ;;  %v1437_v47 = vor.u32 %v1870_v39, %v1436_v38 }
  0x25   :  { %v141_v16 = vld.sshfl [vmem:[#allocation1] sm:$0xff pattern:$0x73625140]  ;;  %v142_v17 = vld.sshfl [vmem:[#allocation1 + $0x8] sm:$0xff pattern:$0x73625140]  ;;  %v1653_v43 = vor.u32 %v1924_v42, %v1652_v40  ;;  %v1533_v52 = vor.u32 %v1894_v45, %v1532_v44 }
  0x26   :  { %v150_v18 = vsel %vm149_vm1, %v141_v16, 0  ;;  %v152_v19 = vsel %vm149_vm1, %v142_v17, 0  ;;  %v143_v20 = vld.sshfl [vmem:[#allocation1 + $0x10] sm:$0xff pattern:$0x73625140]  ;;  %1370 = vmatmul.msk.bf16.vlgmr.msra.gmra.mxu0 %vm220_vm2, %v2245_v11  ;;  %vm1356_vm4 = vcmask 1024  }
  0x27   :  { %165 = vmatpush.bf16.msra.mxu3 %v150_v18  ;;  %178 = vmatpush.bf16.msra.mxu1 %v152_v19  ;;  %v154_v23 = vsel %vm149_vm1, %v143_v20, 0  ;;  %v144_v24 = vld.sshfl [vmem:[#allocation1 + $0x18] sm:$0xff pattern:$0x73625140]  ;;  %v1921_v48 = vld [vmem:[#allocation10 + $0x218] sm:$0xf0] }
  0x28   :  { %191 = vmatpush.bf16.msra.mxu2 %v154_v23  ;;  %v156_v25 = vsel %vm149_vm1, %v144_v24, 0  ;;  %959 = vmatpush.bf16.msrb.mxu0 %v1461_v30  ;;  %v1640_v46 = vld [vmem:[#allocation10 + $0x210] sm:$0xf]  ;;  %v1424_v49 = vld [vmem:[#allocation10 + $0x60] sm:$0xf] }
  0x29   :  { %v1867_v50 = vld [vmem:[#allocation10 + $0x68] sm:$0xf0]  ;;  %v1641_v51 = vor.u32 %v1921_v48, %v1640_v46  ;;  %v1520_v53 = vld [vmem:[#allocation10 + $0x120] sm:$0xf]  ;;  %v1628_v56 = vld [vmem:[#allocation10 + $0x1f8] sm:$0xf] }
  0x2a   :  { %1366 = vmatmul.msk.bf16.vlgmr.msra.gmra.mxu3 %vm145_vm3, %v2250_v21  ;;  %1367 = vmatmul.msk.bf16.vlgmr.msra.gmra.mxu1 %vm145_vm3, %v2250_v21  ;;  %v1891_v54 = vld [vmem:[#allocation10 + $0x128] sm:$0xf0]  ;;  %v1425_v55 = vor.u32 %v1867_v50, %v1424_v49  ;;  %v1918_v57 = vld [vmem:[#allocation10 + $0x200] sm:$0xf0]  ;;  %v1412_v58 = vld [vmem:[#allocation10 + $0x48] sm:$0xf] }
  0x2b   :  { %257 = vmatpush.bf16.msrb.mxu1 %v229_v14  ;;  %204 = vmatpush.bf16.msrb.mxu3 %v156_v25  ;;  %v1864_v59 = vld [vmem:[#allocation10 + $0x50] sm:$0xf0]  ;;  %v1521_v60 = vor.u32 %v1891_v54, %v1520_v53  ;;  %v1748_v61 = vld [vmem:[#allocation10 + $0x2e8] sm:$0xf]  ;;  %v1629_v63 = vor.u32 %v1918_v57, %v1628_v56  ;;  %v1400_v4 = vld [vmem:[#allocation10 + $0x30] sm:$0xf] }
  0x2c   :  { %270 = vmatpush.bf16.msrb.mxu2 %v232_v22  ;;  %960 = vmatpush.bf16.msrb.mxu0 %v1449_v34  ;;  %v1948_v62 = vld [vmem:[#allocation10 + $0x2f0] sm:$0xf0]  ;;  %v1508_v0 = vld [vmem:[#allocation10 + $0x108] sm:$0xf]  ;;  %v1413_v3 = vor.u32 %v1864_v59, %v1412_v58  ;;  %v1616_v5 = vld [vmem:[#allocation10 + $0x1e0] sm:$0xf] }
  0x2d   :  { %1368 = vmatmul.msk.bf16.vlgmr.msra.gmra.mxu2 %vm145_vm3, %v2250_v21  ;;  %v1888_v1 = vld [vmem:[#allocation10 + $0x110] sm:$0xf0]  ;;  %v1749_v2 = vor.u32 %v1948_v62, %v1748_v61  ;;  %v1915_v6 = vld [vmem:[#allocation10 + $0x1e8] sm:$0xf0]  ;;  %v1861_v7 = vld [vmem:[#allocation10 + $0x38] sm:$0xf0] }
  0x2e   :  { %v1736_v8 = vld [vmem:[#allocation10 + $0x2d0] sm:$0xf]  ;;  %v1945_v9 = vld [vmem:[#allocation10 + $0x2d8] sm:$0xf0]  ;;  %v1509_v10 = vor.u32 %v1888_v1, %v1508_v0  ;;  %v1617_v12 = vor.u32 %v1915_v6, %v1616_v5  ;;  %v1604_v15 = vld [vmem:[#allocation10 + $0x1c8] sm:$0xf]  ;;  %v1401_v17 = vor.u32 %v1861_v7, %v1400_v4 }
  0x2f   :  { %283 = vmatpush.bf16.msra.mxu3 %v235_v26  ;;  %972 = vmatpush.bf16.msra.mxu1 %v1557_v35  ;;  %v1496_v13 = vld [vmem:[#allocation10 + $0xf0] sm:$0xf]  ;;  %v1885_v14 = vld [vmem:[#allocation10 + $0xf8] sm:$0xf0]  ;;  %v1737_v16 = vor.u32 %v1945_v9, %v1736_v8  ;;  %v1912_v18 = vld [vmem:[#allocation10 + $0x1d0] sm:$0xf0] }
  0x30   :  { %985 = vmatpush.bf16.msra.mxu2 %v1653_v43  ;;  %961 = vmatpush.bf16.msrb.mxu0 %v1437_v47  ;;  %v1724_v19 = vld [vmem:[#allocation10 + $0x2b8] sm:$0xf]  ;;  %v1942_v20 = vld [vmem:[#allocation10 + $0x2c0] sm:$0xf0]  ;;  %v1497_v23 = vor.u32 %v1885_v14, %v1496_v13  ;;  %v1605_v24 = vor.u32 %v1912_v18, %v1604_v15  ;;  %v1592_v29 = vld [vmem:[#allocation10 + $0x1b0] sm:$0xf] }
  0x31   :  { %v1858_v22 = vld [vmem:[#allocation10 + $0x20] sm:$0xf0]  ;;  %v1484_v25 = vld [vmem:[#allocation10 + $0xd8] sm:$0xf]  ;;  %v1725_v27 = vor.u32 %v1942_v20, %v1724_v19  ;;  %v1909_v30 = vld [vmem:[#allocation10 + $0x1b8] sm:$0xf0] }
  0x32   :  { %v1882_v26 = vld [vmem:[#allocation10 + $0xe0] sm:$0xf0]  ;;  %v1376_v31 = vld [vmem:[#allocation10] sm:$0xf]  ;;  %v1855_v32 = vld [vmem:[#allocation10 + $0x8] sm:$0xf0]  ;;  %v1593_v36 = vor.u32 %v1909_v30, %v1592_v29 }
  0x33   :  { %973 = vmatpush.bf16.msra.mxu1 %v1545_v41  ;;  %v1875_v33 = vld [vmem:[#allocation10 + $0xac] sm:$0xf]  ;;  %v1462_v34 = vld [vmem:[#allocation10 + $0xb4] sm:$0xf0]  ;;  %v1485_v35 = vor.u32 %v1882_v26, %v1484_v25  ;;  %v1472_v37 = vld [vmem:[#allocation10 + $0xc0] sm:$0xf]  ;;  %v1377_v40 = vor.u32 %v1855_v32, %v1376_v31 }
  0x34   :  { %986 = vmatpush.bf16.msra.mxu2 %v1641_v51  ;;  %962 = vmatpush.bf16.msrb.mxu0 %v1425_v55  ;;  %v1879_v38 = vld [vmem:[#allocation10 + $0xc8] sm:$0xf0]  ;;  %v1558_v41 = vld [vmem:[#allocation10 + $0x174] sm:$0xf0]  ;;  %v1906_v43 = vld [vmem:[#allocation10 + $0x1a0] sm:$0xf0]  ;;  %v1465_v44 = vor.u32 %v1875_v33, %v1462_v34 }
  0x35   :  { %v1899_v39 = vld [vmem:[#allocation10 + $0x16c] sm:$0xf]  ;;  %v1580_v42 = vld [vmem:[#allocation10 + $0x198] sm:$0xf]  ;;  %v1872_v45 = vld [vmem:[#allocation10 + $0x94] sm:$0xf]  ;;  %v1473_v47 = vor.u32 %v1879_v38, %v1472_v37 }
  0x36   :  { %v1450_v46 = vld [vmem:[#allocation10 + $0x9c] sm:$0xf0]  ;;  %v1561_v48 = vor.u32 %v1899_v39, %v1558_v41  ;;  %v1581_v49 = vor.u32 %v1906_v43, %v1580_v42  ;;  %v1869_v51 = vld [vmem:[#allocation10 + $0x7c] sm:$0xf]  ;;  %v1866_v54 = vld [vmem:[#allocation10 + $0x64] sm:$0xf] }
  0x37   :  { %974 = vmatpush.bf16.msra.mxu1 %v1533_v52  ;;  %v1453_v50 = vor.u32 %v1872_v45, %v1450_v46  ;;  %v1438_v52 = vld [vmem:[#allocation10 + $0x84] sm:$0xf0]  ;;  %v1426_v55 = vld [vmem:[#allocation10 + $0x6c] sm:$0xf0]  ;;  %v1896_v57 = vld [vmem:[#allocation10 + $0x154] sm:$0xf] }
  0x38   :  { %987 = vmatpush.bf16.msra.mxu2 %v1629_v63  ;;  %963 = vmatpush.bf16.msrb.mxu0 %v1413_v3  ;;  %v1441_v53 = vor.u32 %v1869_v51, %v1438_v52  ;;  %v1429_v56 = vor.u32 %v1866_v54, %v1426_v55  ;;  %v1546_v58 = vld [vmem:[#allocation10 + $0x15c] sm:$0xf0]  ;;  %v1903_v61 = vld [vmem:[#allocation10 + $0x188] sm:$0xf0]  ;;  %v1414_v1 = vld [vmem:[#allocation10 + $0x54] sm:$0xf0] }
  0x39   :  { %v1549_v59 = vor.u32 %v1896_v57, %v1546_v58  ;;  %v1939_v63 = vld [vmem:[#allocation10 + $0x2a8] sm:$0xf0]  ;;  %v1654_v5 = vld [vmem:[#allocation10 + $0x234] sm:$0xf0]  ;;  %v1893_v6 = vld [vmem:[#allocation10 + $0x13c] sm:$0xf] }
  0x3a   :  { %1369 = vmatmul.msk.bf16.vlgmr.msrb.gmra.mxu3 %vm145_vm3, %v2250_v21  ;;  %1371 = vmatmul.msk.bf16.vlgmr.msrb.gmra.mxu1 %vm220_vm2, %v2245_v11  ;;  %v1388_v21 = vld [vmem:[#allocation10 + $0x18] sm:$0xf]  ;;  %v1863_v0 = vld [vmem:[#allocation10 + $0x4c] sm:$0xf]  ;;  %v1534_v8 = vld [vmem:[#allocation10 + $0x144] sm:$0xf0] }
  0x3b   :  { %975 = vmatpush.bf16.msra.mxu1 %v1521_v60  ;;  %998 = vmatpush.bf16.msrb.mxu3 %v1749_v2  ;;  %v1389_v28 = vor.u32 %v1858_v22, %v1388_v21  ;;  %v1568_v60 = vld [vmem:[#allocation10 + $0x180] sm:$0xf]  ;;  %v1417_v3 = vor.u32 %v1863_v0, %v1414_v1  ;;  %v1923_v4 = vld [vmem:[#allocation10 + $0x22c] sm:$0xf]  ;;  %v1537_v9 = vor.u32 %v1893_v6, %v1534_v8  ;;  %v1860_v14 = vld [vmem:[#allocation10 + $0x34] sm:$0xf] }
  0x3c   :  { %988 = vmatpush.bf16.msra.mxu2 %v1617_v12  ;;  %964 = vmatpush.bf16.msrb.mxu0 %v1401_v17  ;;  %v1569_v62 = vor.u32 %v1903_v61, %v1568_v60  ;;  %v1657_v7 = vor.u32 %v1923_v4, %v1654_v5  ;;  %v1936_v12 = vld [vmem:[#allocation10 + $0x290] sm:$0xf0]  ;;  %v1402_v15 = vld [vmem:[#allocation10 + $0x3c] sm:$0xf0]  ;;  %v1890_v20 = vld [vmem:[#allocation10 + $0x124] sm:$0xf] }
  0x3d   :  { %1372 = vmatmul.msk.bf16.vlgmr.msrb.gmra.mxu2 %vm220_vm2, %v2245_v11  ;;  %v1405_v17 = vor.u32 %v1860_v14, %v1402_v15  ;;  %v1642_v18 = vld [vmem:[#allocation10 + $0x21c] sm:$0xf0]  ;;  %v1522_v21 = vld [vmem:[#allocation10 + $0x12c] sm:$0xf0]  ;;  %v1857_v26 = vld [vmem:[#allocation10 + $0x1c] sm:$0xf] }
  0x3e   :  { %v1525_v22 = vor.u32 %v1890_v20, %v1522_v21  ;;  %v1630_v30 = vld [vmem:[#allocation10 + $0x204] sm:$0xf0]  ;;  %v1887_v32 = vld [vmem:[#allocation10 + $0x10c] sm:$0xf]  ;;  %v1510_v33 = vld [vmem:[#allocation10 + $0x114] sm:$0xf0] }
  0x3f   :  { %976 = vmatpush.bf16.msra.mxu1 %v1509_v10  ;;  %999 = vmatpush.bf16.msrb.mxu3 %v1737_v16  ;;  %v1700_v10 = vld [vmem:[#allocation10 + $0x288] sm:$0xf]  ;;  %v1920_v16 = vld [vmem:[#allocation10 + $0x214] sm:$0xf]  ;;  %v1513_v34 = vor.u32 %v1887_v32, %v1510_v33  ;;  %v1854_v38 = vld [vmem:[#allocation10 + $0x4] sm:$0xf] }
  0x40   :  { %989 = vmatpush.bf16.msra.mxu2 %v1605_v24  ;;  %965 = vmatpush.bf16.msrb.mxu0 %v1389_v28  ;;  %v1701_v13 = vor.u32 %v1936_v12, %v1700_v10  ;;  %v1645_v19 = vor.u32 %v1920_v16, %v1642_v18  ;;  %v1933_v24 = vld [vmem:[#allocation10 + $0x278] sm:$0xf0]  ;;  %v1378_v39 = vld [vmem:[#allocation10 + $0xc] sm:$0xf0]  ;;  %v1498_v45 = vld [vmem:[#allocation10 + $0xfc] sm:$0xf0] }
  0x41   :  { %v1917_v28 = vld [vmem:[#allocation10 + $0x1fc] sm:$0xf]  ;;  %v1381_v41 = vor.u32 %v1854_v38, %v1378_v39  ;;  %v1618_v42 = vld [vmem:[#allocation10 + $0x1ec] sm:$0xf0]  ;;  %v1606_v51 = vld [vmem:[#allocation10 + $0x1d4] sm:$0xf0] }
  0x42   :  { %v1633_v31 = vor.u32 %v1917_v28, %v1630_v30  ;;  %v1750_v54 = vld [vmem:[#allocation10 + $0x2f4] sm:$0xf0]  ;;  %v1486_v57 = vld [vmem:[#allocation10 + $0xe4] sm:$0xf0]  ;;  %v1594_v60 = vld [vmem:[#allocation10 + $0x1bc] sm:$0xf0] }
  0x43   :  { %977 = vmatpush.bf16.msra.mxu1 %v1497_v23  ;;  %1000 = vmatpush.bf16.msrb.mxu3 %v1725_v27  ;;  %v1688_v23 = vld [vmem:[#allocation10 + $0x270] sm:$0xf]  ;;  %v1390_v27 = vld [vmem:[#allocation10 + $0x24] sm:$0xf0]  ;;  %v1944_v61 = vld [vmem:[#allocation10 + $0x2d4] sm:$0xf] }
  0x44   :  { %990 = vmatpush.bf16.msra.mxu2 %v1593_v36  ;;  %966 = vmatpush.bf16.msrb.mxu0 %v1377_v40  ;;  %v1689_v25 = vor.u32 %v1933_v24, %v1688_v23  ;;  %v1393_v29 = vor.u32 %v1857_v26, %v1390_v27  ;;  %v1930_v36 = vld [vmem:[#allocation10 + $0x260] sm:$0xf0]  ;;  %v1474_v1 = vld [vmem:[#allocation10 + $0xcc] sm:$0xf0]  ;;  %v1582_v4 = vld [vmem:[#allocation10 + $0x1a4] sm:$0xf0] }
  0x45   :  { %v1914_v40 = vld [vmem:[#allocation10 + $0x1e4] sm:$0xf]  ;;  %v1941_v5 = vld [vmem:[#allocation10 + $0x2bc] sm:$0xf]  ;;  %v1570_v12 = vld [vmem:[#allocation10 + $0x18c] sm:$0xf0] }
  0x46   :  { %v1621_v43 = vor.u32 %v1914_v40, %v1618_v42  ;;  %v1878_v0 = vld [vmem:[#allocation10 + $0xc4] sm:$0xf]  ;;  %v1714_v15 = vld [vmem:[#allocation10 + $0x2ac] sm:$0xf0]  ;;  %v1935_v18 = vld [vmem:[#allocation10 + $0x28c] sm:$0xf] }
  0x47   :  { %978 = vmatpush.bf16.msra.mxu1 %v1485_v35  ;;  %v1676_v35 = vld [vmem:[#allocation10 + $0x258] sm:$0xf]  ;;  %v1902_v10 = vld [vmem:[#allocation10 + $0x184] sm:$0xf]  ;;  %v2272_v20 = vld [vmem:[#allocation9] sm:$0xf] }
  0x48   :  { %1011 = vmatpush.bf16.msra.mxu0 %v1465_v44  ;;  %991 = vmatpush.bf16.msra.mxu2 %v1581_v49  ;;  %v1677_v37 = vor.u32 %v1930_v36, %v1676_v35  ;;  %v1884_v44 = vld [vmem:[#allocation10 + $0xf4] sm:$0xf]  ;;  %v1573_v14 = vor.u32 %v1902_v10, %v1570_v12  ;;  %v291_v23 = vperm.slane %v2272_v20, 0  ;;  %v1877_v33 = vld [vmem:[#allocation10 + $0xb8] sm:$0xf0] }
  0x49   :  { %v1501_v46 = vor.u32 %v1884_v44, %v1498_v45  ;;  %v1932_v24 = vld [vmem:[#allocation10 + $0x274] sm:$0xf]  ;;  %v1678_v35 = vld [vmem:[#allocation10 + $0x264] sm:$0xf0]  ;;  %v1456_v39 = vld [vmem:[#allocation10 + $0x98] sm:$0xf] }
  0x4a   :  { %1373 = vmatmul.msk.bf16.vlgmr.msra.gmra.mxu3 %vm220_vm2, %v2245_v11  ;;  %v1712_v11 = vld [vmem:[#allocation10 + $0x2a0] sm:$0xf]  ;;  %v1926_v42 = vld [vmem:[#allocation10 + $0x244] sm:$0xf]  ;;  %v1925_v10 = vld [vmem:[#allocation10 + $0x238] sm:$0xf0] }
  0x4b   :  { %979 = vmatpush.bf16.msra.mxu1 %v1473_v47  ;;  %v1713_v2 = vor.u32 %v1939_v63, %v1712_v11  ;;  %v1664_v47 = vld [vmem:[#allocation10 + $0x240] sm:$0xf] }
  0x4c   :  { %1012 = vmatpush.bf16.msra.mxu0 %v1453_v50  ;;  %992 = vmatpush.bf16.msra.mxu2 %v1569_v62  ;;  %v1911_v50 = vld [vmem:[#allocation10 + $0x1cc] sm:$0xf]  ;;  %v1738_v62 = vld [vmem:[#allocation10 + $0x2dc] sm:$0xf0] }
  0x4d   :  { %1001 = vmatpush.bf16.msrb.mxu3 %v1713_v2  ;;  %v1609_v52 = vor.u32 %v1911_v50, %v1606_v51  ;;  %v1741_v63 = vor.u32 %v1944_v61, %v1738_v62  ;;  %v1477_v2 = vor.u32 %v1878_v0, %v1474_v1  ;;  %v1444_v51 = vld [vmem:[#allocation10 + $0x80] sm:$0xf]  ;;  %v293_v61 = vperm.slane %v2272_v20, 2  ;;  %v1552_v0 = vld [vmem:[#allocation10 + $0x158] sm:$0xf] }
  0x4e   :  { %v1898_v1 = vld [vmem:[#allocation10 + $0x160] sm:$0xf0]  ;;  %v1540_v12 = vld [vmem:[#allocation10 + $0x140] sm:$0xf] }
  0x4f   :  { %1024 = vmatpush.bf16.msrb.mxu1 %v1561_v48  ;;  %v1927_v48 = vld [vmem:[#allocation10 + $0x248] sm:$0xf0] }
  0x50   :  { %1013 = vmatpush.bf16.msra.mxu0 %v1441_v53  ;;  %1037 = vmatpush.bf16.msrb.mxu2 %v1657_v7  ;;  %v1665_v49 = vor.u32 %v1927_v48, %v1664_v47  ;;  %v1947_v53 = vld [vmem:[#allocation10 + $0x2ec] sm:$0xf]  ;;  %v1726_v7 = vld [vmem:[#allocation10 + $0x2c4] sm:$0xf0]  ;;  %v292_v47 = vperm.slane %v2272_v20, 1 }
  0x51   :  { %1002 = vmatpush.bf16.msrb.mxu3 %v1701_v13  ;;  %v1753_v55 = vor.u32 %v1947_v53, %v1750_v54  ;;  %v1729_v8 = vor.u32 %v1941_v5, %v1726_v7  ;;  %v1938_v13 = vld [vmem:[#allocation10 + $0x2a4] sm:$0xf]  ;;  %v1564_v54 = vld [vmem:[#allocation10 + $0x170] sm:$0xf] }
  0x52   :  { %v1717_v16 = vor.u32 %v1938_v13, %v1714_v15  ;;  %v1420_v5 = vld [vmem:[#allocation10 + $0x50] sm:$0xf]  ;;  %v1895_v13 = vld [vmem:[#allocation10 + $0x148] sm:$0xf0] }
  0x53   :  { %1025 = vmatpush.bf16.msrb.mxu1 %v1549_v59  ;;  %v1908_v59 = vld [vmem:[#allocation10 + $0x1b4] sm:$0xf] }
  0x54   :  { %1014 = vmatpush.bf16.msra.mxu0 %v1429_v56  ;;  %1038 = vmatpush.bf16.msrb.mxu2 %v1645_v19  ;;  %v1881_v56 = vld [vmem:[#allocation10 + $0xdc] sm:$0xf]  ;;  %v1597_v11 = vor.u32 %v1908_v59, %v1594_v60  ;;  %v1702_v19 = vld [vmem:[#allocation10 + $0x294] sm:$0xf0]  ;;  %v1868_v59 = vld [vmem:[#allocation10 + $0x70] sm:$0xf0] }
  0x55   :  { %1003 = vmatpush.bf16.msrb.mxu3 %v1689_v25  ;;  %v1489_v58 = vor.u32 %v1881_v56, %v1486_v57  ;;  %v1705_v21 = vor.u32 %v1935_v18, %v1702_v19  ;;  %v1690_v25 = vld [vmem:[#allocation10 + $0x27c] sm:$0xf0]  ;;  %v1862_v18 = vld [vmem:[#allocation10 + $0x40] sm:$0xf0] }
  0x56   :  { %v1693_v27 = vor.u32 %v1932_v24, %v1690_v25  ;;  %v1922_v24 = vld [vmem:[#allocation10 + $0x220] sm:$0xf0] }
  0x57   :  { %1026 = vmatpush.bf16.msrb.mxu1 %v1537_v9 }
  0x58   :  { %1015 = vmatpush.bf16.msra.mxu0 %v1417_v3  ;;  %1039 = vmatpush.bf16.msrb.mxu2 %v1633_v31  ;;  %v1905_v3 = vld [vmem:[#allocation10 + $0x19c] sm:$0xf]  ;;  %v1468_v31 = vld [vmem:[#allocation10 + $0xb0] sm:$0xf] }
  0x59   :  { %1004 = vmatpush.bf16.msrb.mxu3 %v1677_v37  ;;  %v1585_v6 = vor.u32 %v1905_v3, %v1582_v4  ;;  %v1469_v38 = vor.u32 %v1877_v33, %v1468_v31  ;;  %v1859_v31 = vld [vmem:[#allocation10 + $0x28] sm:$0xf0]  ;;  %v1636_v33 = vld [vmem:[#allocation10 + $0x200] sm:$0xf] }
  0x5b   :  { %1027 = vmatpush.bf16.msrb.mxu1 %v1525_v22 }
  0x5c   :  { %1016 = vmatpush.bf16.msra.mxu0 %v1405_v17  ;;  %1040 = vmatpush.bf16.msrb.mxu2 %v1621_v43  ;;  %v1666_v43 = vld [vmem:[#allocation10 + $0x24c] sm:$0xf0] }
  0x5d   :  { %1005 = vmatpush.bf16.msrb.mxu3 %v1665_v49  ;;  %v1669_v45 = vor.u32 %v1926_v42, %v1666_v43  ;;  %v1856_v42 = vld [vmem:[#allocation10 + $0x10] sm:$0xf0] }
  0x5f   :  { %1028 = vmatpush.bf16.msrb.mxu1 %v1513_v34  ;;  %v1929_v34 = vld [vmem:[#allocation10 + $0x25c] sm:$0xf] }
  0x60   :  { %1017 = vmatpush.bf16.msra.mxu0 %v1393_v29  ;;  %1041 = vmatpush.bf16.msrb.mxu2 %v1609_v52  ;;  %v1681_v36 = vor.u32 %v1929_v34, %v1678_v35  ;;  %v1871_v52 = vld [vmem:[#allocation10 + $0x88] sm:$0xf0]  ;;  %v1516_v35 = vld [vmem:[#allocation10 + $0x110] sm:$0xf] }
  0x61   :  { %1050 = vmatpush.bf16.msra.mxu3 %v1753_v55  ;;  %v1901_v55 = vld [vmem:[#allocation10 + $0x178] sm:$0xf0]  ;;  %v1445_v56 = vor.u32 %v1871_v52, %v1444_v51  ;;  %v1919_v34 = vld [vmem:[#allocation10 + $0x208] sm:$0xf0] }
  0x63   :  { %1029 = vmatpush.bf16.msrb.mxu1 %v1501_v46 }
  0x64   :  { %1018 = vmatpush.bf16.msra.mxu0 %v1381_v41  ;;  %1042 = vmatpush.bf16.msrb.mxu2 %v1597_v11  ;;  %v1874_v41 = vld [vmem:[#allocation10 + $0xa0] sm:$0xf0]  ;;  %v1565_v11 = vor.u32 %v1901_v55, %v1564_v54  ;;  %v1612_v55 = vld [vmem:[#allocation10 + $0x1d0] sm:$0xf] }
  0x65   :  { %1051 = vmatpush.bf16.msra.mxu3 %v1741_v63  ;;  %v1457_v49 = vor.u32 %v1874_v41, %v1456_v39  ;;  %v1637_v39 = vor.u32 %v1919_v34, %v1636_v33  ;;  %v1384_v41 = vld [vmem:[#allocation10 + $0x8] sm:$0xf]  ;;  %v1928_v34 = vld [vmem:[#allocation10 + $0x250] sm:$0xf0] }
  0x66   :  { %v1672_v33 = vld [vmem:[#allocation10 + $0x248] sm:$0xf] }
  0x67   :  { %1030 = vmatpush.bf16.msrb.mxu1 %v1489_v58  ;;  %v1432_v58 = vld [vmem:[#allocation10 + $0x68] sm:$0xf] }
  0x68   :  { %1043 = vmatpush.bf16.msrb.mxu2 %v1585_v6  ;;  %v1433_v3 = vor.u32 %v1868_v59, %v1432_v58  ;;  %v1865_v6 = vld [vmem:[#allocation10 + $0x58] sm:$0xf0]  ;;  %v1492_v58 = vld [vmem:[#allocation10 + $0xe0] sm:$0xf]  ;;  %v1883_v59 = vld [vmem:[#allocation10 + $0xe8] sm:$0xf0] }
  0x69   :  { %1052 = vmatpush.bf16.msra.mxu3 %v1729_v8  ;;  %v1553_v8 = vor.u32 %v1898_v1, %v1552_v0  ;;  %v1421_v15 = vor.u32 %v1865_v6, %v1420_v5  ;;  %v1946_v0 = vld [vmem:[#allocation10 + $0x2e0] sm:$0xf0]  ;;  %v1480_v5 = vld [vmem:[#allocation10 + $0xc8] sm:$0xf]  ;;  %v1880_v6 = vld [vmem:[#allocation10 + $0xd0] sm:$0xf0] }
  0x6b   :  { %1031 = vmatpush.bf16.msrb.mxu1 %v1477_v2 }
  0x6c   :  { %1044 = vmatpush.bf16.msrb.mxu2 %v1573_v14 }
  0x6d   :  { %1053 = vmatpush.bf16.msra.mxu3 %v1717_v16 }
  0x71   :  { %1054 = vmatpush.bf16.msra.mxu3 %v1705_v21 }
  0x75   :  { %1055 = vmatpush.bf16.msra.mxu3 %v1693_v27  ;;  %v1892_v27 = vld [vmem:[#allocation10 + $0x130] sm:$0xf0] }
  0x79   :  { %1056 = vmatpush.bf16.msra.mxu3 %v1681_v36  ;;  %v1889_v36 = vld [vmem:[#allocation10 + $0x118] sm:$0xf0] }
  0x7d   :  { %1057 = vmatpush.bf16.msra.mxu3 %v1669_v45  ;;  %v1624_v45 = vld [vmem:[#allocation10 + $0x1e8] sm:$0xf] }
  0xa3   :  { %v246_v9 = vpop.f32.mrf.mxu0 }
  0xa7   :  { %v180_v17 = vpop.f32.mrf.mxu1 }
  0xab   :  { %v248_v22 = vpop.f32.mrf.mxu0 }
  0xac   :  { %v1541_v22 = vor.u32 %v1895_v13, %v1540_v12  ;;  %v1481_v12 = vor.u32 %v1880_v6, %v1480_v5  ;;  %v1588_v13 = vld [vmem:[#allocation10 + $0x1a0] sm:$0xf] }
  0xad   :  { %v167_v26 = vpop.f32.mrf.mxu3 }
  0xae   :  { %v247_v29 = vadd.f32 %v246_v9, %v167_v26  ;;  %v1660_v9 = vld [vmem:[#allocation10 + $0x230] sm:$0xf]  ;;  %v1528_v26 = vld [vmem:[#allocation10 + $0x128] sm:$0xf] }
  0xaf   :  { %v182_v30 = vpop.f32.mrf.mxu1  ;;  %v1661_v16 = vor.u32 %v1925_v10, %v1660_v9  ;;  %v1732_v9 = vld [vmem:[#allocation10 + $0x2c0] sm:$0xf]  ;;  %v1943_v10 = vld [vmem:[#allocation10 + $0x2c8] sm:$0xf0] }
  0xb0   :  { %v193_v28 = vpop.f32.mrf.mxu2  ;;  %v299_v32 = vadd.f32 %v291_v23, %v247_v29  ;;  %v1648_v23 = vld [vmem:[#allocation10 + $0x218] sm:$0xf]  ;;  %v1396_v30 = vld [vmem:[#allocation10 + $0x20] sm:$0xf] }
  0xb1   :  { %v1649_v29 = vor.u32 %v1922_v24, %v1648_v23  ;;  %v1708_v24 = vld [vmem:[#allocation10 + $0x290] sm:$0xf] }
  0xb2   :  { %v303_v37 = vmax.f32 %v299_v32, 0.0  ;;  %v1529_v32 = vor.u32 %v1892_v27, %v1528_v26  ;;  %v1696_v27 = vld [vmem:[#allocation10 + $0x278] sm:$0xf] }
  0xb4   :  { %v2275_v40 = vpack.c.bf16 %v303_v37, %v303_v37  ;;  %v1397_v37 = vor.u32 %v1859_v31, %v1396_v30  ;;  %v1684_v30 = vld [vmem:[#allocation10 + $0x260] sm:$0xf]  ;;  %v1931_v31 = vld [vmem:[#allocation10 + $0x268] sm:$0xf0] }
  0xb5   :  { %v169_v44 = vpop.f32.mrf.mxu3 }
  0xb6   :  { %967 = vmatmul.bf16.vlgmr.msrb.gmra.mxu0 %v2275_v40  ;;  %v1517_v44 = vor.u32 %v1889_v36, %v1516_v35  ;;  %v1957_v35 = vld [vmem:[#allocation12 + $0x38] sm:$0xff]  ;;  %v1956_v36 = vld [vmem:[#allocation12 + $0x30] sm:$0xff] }
  0xb7   :  { %v259_v48 = vpop.f32.mrf.mxu1  ;;  %1063 = vmatpush.bf16.msrb.mxu0 %v1469_v38  ;;  %v294_v38 = vperm.slane %v2272_v20, 3  ;;  %v1949_v20 = vld [vmem:[#allocation10 + $0x2f8] sm:$0xf0] }
  0xb8   :  { %v195_v46 = vpop.f32.mrf.mxu2  ;;  %v260_v50 = vadd.f32 %v259_v48, %v180_v17  ;;  %v1408_v17 = vld [vmem:[#allocation10 + $0x38] sm:$0xf] }
  0xb9   :  { %v1916_v46 = vld [vmem:[#allocation10 + $0x1f0] sm:$0xf0]  ;;  %v1504_v48 = vld [vmem:[#allocation10 + $0xf8] sm:$0xf] }
  0xba   :  { %v300_v53 = vadd.f32 %v292_v47, %v260_v50  ;;  %v1385_v50 = vor.u32 %v1856_v42, %v1384_v41  ;;  %v1625_v52 = vor.u32 %v1916_v46, %v1624_v45  ;;  %v1952_v42 = vld [vmem:[#allocation12 + $0x10] sm:$0xff]  ;;  %v1963_v45 = vld [vmem:[#allocation12 + $0x68] sm:$0xff] }
  0xbb   :  { %1064 = vmatpush.bf16.msrb.mxu0 %v1457_v49  ;;  %v1886_v49 = vld [vmem:[#allocation10 + $0x100] sm:$0xf0] }
  0xbc   :  { %v304_v57 = vmax.f32 %v300_v53, 0.0  ;;  %v1756_v53 = vld [vmem:[#allocation10 + $0x2f0] sm:$0xf]  ;;  %v1505_v54 = vor.u32 %v1886_v49, %v1504_v48  ;;  %v1962_v48 = vld [vmem:[#allocation12 + $0x60] sm:$0xff] }
  0xbd   :  { %v206_v60 = vpop.f32.mrf.mxu3 }
  0xbe   :  { %v2280_v62 = vpack.c.bf16 %v304_v57, %v304_v57 }
  0xbf   :  { %1065 = vmatpush.bf16.msrb.mxu0 %v1445_v56  ;;  %v261_v4 = vpop.f32.mrf.mxu1  ;;  %v1913_v56 = vld [vmem:[#allocation10 + $0x1d8] sm:$0xf0] }
  0xc0   :  { %v272_v63 = vpop.f32.mrf.mxu2  ;;  %980 = vmatmul.bf16.vlgmr.msra.gmra.mxu1 %v2280_v62  ;;  %v1910_v4 = vld [vmem:[#allocation10 + $0x1c0] sm:$0xf0] }
  0xc1   :  { %v273_v2 = vadd.f32 %v272_v63, %v193_v28  ;;  %1076 = vmatpush.bf16.msra.mxu1 %v1565_v11  ;;  %v1409_v28 = vor.u32 %v1862_v18, %v1408_v17  ;;  %v1613_v11 = vor.u32 %v1913_v56, %v1612_v55  ;;  %v1744_v63 = vld [vmem:[#allocation10 + $0x2d8] sm:$0xf]  ;;  %v1720_v17 = vld [vmem:[#allocation10 + $0x2a8] sm:$0xf] }
  0xc2   :  { %v1576_v18 = vld [vmem:[#allocation10 + $0x188] sm:$0xf] }
  0xc3   :  { %v301_v7 = vadd.f32 %v293_v61, %v273_v2  ;;  %1066 = vmatpush.bf16.msrb.mxu0 %v1433_v3  ;;  %v1493_v2 = vor.u32 %v1883_v59, %v1492_v58  ;;  %v1600_v3 = vld [vmem:[#allocation10 + $0x1b8] sm:$0xf]  ;;  %v1959_v55 = vld [vmem:[#allocation12 + $0x48] sm:$0xff]  ;;  %v1958_v59 = vld [vmem:[#allocation12 + $0x40] sm:$0xff] }
  0xc4   :  { %v1971_v56 = vld [vmem:[#allocation12 + $0xa8] sm:$0xff] }
  0xc5   :  { %v305_v14 = vmax.f32 %v301_v7, 0.0  ;;  %v208_v21 = vpop.f32.mrf.mxu3  ;;  %1077 = vmatpush.bf16.msra.mxu1 %v1553_v8  ;;  %v1745_v7 = vor.u32 %v1946_v0, %v1744_v63  ;;  %v1601_v8 = vor.u32 %v1910_v4, %v1600_v3  ;;  %v1969_v0 = vld [vmem:[#allocation12 + $0x98] sm:$0xff] }
  0xc6   :  { %1019 = vmatmul.bf16.vlgmr.msra.gmra.mxu0 %v2275_v40  ;;  %v1904_v21 = vld [vmem:[#allocation10 + $0x190] sm:$0xf0] }
  0xc7   :  { %v2283_v19 = vpack.c.bf16 %v305_v14, %v305_v14  ;;  %1067 = vmatpush.bf16.msrb.mxu0 %v1421_v15  ;;  %v1907_v14 = vld [vmem:[#allocation10 + $0x1a8] sm:$0xf0]  ;;  %v1733_v15 = vor.u32 %v1943_v10, %v1732_v9  ;;  %v1577_v23 = vor.u32 %v1904_v21, %v1576_v18 }
  0xc8   :  { %v274_v25 = vpop.f32.mrf.mxu2 }
  0xc9   :  { %993 = vmatmul.bf16.vlgmr.msra.gmra.mxu2 %v2283_v19  ;;  %1078 = vmatpush.bf16.msra.mxu1 %v1541_v22  ;;  %v1937_v25 = vld [vmem:[#allocation10 + $0x298] sm:$0xf0] }
  0xca   :  { %1089 = vmatpush.bf16.msra.mxu2 %v1661_v16  ;;  %v1589_v16 = vor.u32 %v1907_v14, %v1588_v13  ;;  %v1709_v26 = vor.u32 %v1937_v25, %v1708_v24 }
  0xcb   :  { %1068 = vmatpush.bf16.msrb.mxu0 %v1409_v28  ;;  %v1934_v28 = vld [vmem:[#allocation10 + $0x280] sm:$0xf0] }
  0xcd   :  { %v285_v43 = vpop.f32.mrf.mxu3  ;;  %1079 = vmatpush.bf16.msra.mxu1 %v1529_v32  ;;  %v1685_v32 = vor.u32 %v1931_v31, %v1684_v30 }
  0xce   :  { %1090 = vmatpush.bf16.msra.mxu2 %v1649_v29  ;;  %v286_v47 = vadd.f32 %v285_v43, %v206_v60  ;;  %v1757_v60 = vor.u32 %v1949_v20, %v1756_v53  ;;  %v1697_v29 = vor.u32 %v1934_v28, %v1696_v27  ;;  %v1964_v43 = vld [vmem:[#allocation12 + $0x70] sm:$0xff] }
  0xcf   :  { %1069 = vmatpush.bf16.msrb.mxu0 %v1397_v37  ;;  %v1955_v37 = vld [vmem:[#allocation12 + $0x28] sm:$0xff]  ;;  %v1960_v53 = vld [vmem:[#allocation12 + $0x50] sm:$0xff] }
  0xd0   :  { %v302_v51 = vadd.f32 %v294_v38, %v286_v47  ;;  %1032 = vmatmul.bf16.vlgmr.msrb.gmra.mxu1 %v2280_v62  ;;  %v1954_v38 = vld [vmem:[#allocation12 + $0x20] sm:$0xff]  ;;  %v1972_v20 = vld [vmem:[#allocation12 + $0xb0] sm:$0xff] }
  0xd1   :  { %1080 = vmatpush.bf16.msra.mxu1 %v1517_v44  ;;  %v1951_v44 = vld [vmem:[#allocation12 + $0x8] sm:$0xff]  ;;  %v1950_v47 = vld [vmem:[#allocation12] sm:$0xff] }
  0xd2   :  { %1091 = vmatpush.bf16.msra.mxu2 %v1637_v39  ;;  %v306_v57 = vmax.f32 %v302_v51, 0.0  ;;  %v1965_v39 = vld [vmem:[#allocation12 + $0x78] sm:$0xff] }
  0xd3   :  { %1070 = vmatpush.bf16.msrb.mxu0 %v1385_v50  ;;  %v1961_v50 = vld [vmem:[#allocation12 + $0x58] sm:$0xff] }
  0xd4   :  { %v310_v61 = vpack.c.bf16 %v306_v57, %v306_v57  ;;  %v1973_v51 = vld [vmem:[#allocation12 + $0xb8] sm:$0xff] }
  0xd5   :  { %v287_v1 = vpop.f32.mrf.mxu3  ;;  %1081 = vmatpush.bf16.msra.mxu1 %v1505_v54 }
  0xd6   :  { %1092 = vmatpush.bf16.msra.mxu2 %v1625_v52  ;;  %1006 = vmatmul.bf16.vlgmr.msrb.gmra.mxu3 %v310_v61 }
  0xd7   :  { %1071 = vmatmul.bf16.vlgmr.msrb.gmra.mxu0 %v2275_v40  ;;  %1102 = vmatpush.bf16.msrb.mxu3 %v1757_v60  ;;  %v1940_v40 = vld [vmem:[#allocation10 + $0x2b0] sm:$0xf0]  ;;  %v1970_v60 = vld [vmem:[#allocation12 + $0xa0] sm:$0xff] }
  0xd8   :  { %v1721_v22 = vor.u32 %v1940_v40, %v1720_v17  ;;  %1317 = vmatpush.bf16.msra.mxu0 %v1957_v35 }
  0xd9   :  { %1045 = vmatmul.bf16.vlgmr.msrb.gmra.mxu2 %v2283_v19  ;;  %1082 = vmatpush.bf16.msra.mxu1 %v1493_v2  ;;  %v1968_v2 = vld [vmem:[#allocation12 + $0x90] sm:$0xff] }
  0xda   :  { %1093 = vmatpush.bf16.msra.mxu2 %v1613_v11 }
  0xdb   :  { %1103 = vmatpush.bf16.msrb.mxu3 %v1745_v7 }
  0xdc   :  { %1318 = vmatpush.bf16.msra.mxu0 %v1956_v36 }
  0xdd   :  { %1083 = vmatpush.bf16.msra.mxu1 %v1481_v12 }
  0xde   :  { %1094 = vmatpush.bf16.msra.mxu2 %v1601_v8  ;;  %v1967_v8 = vld [vmem:[#allocation12 + $0x88] sm:$0xff] }
  0xdf   :  { %1104 = vmatpush.bf16.msrb.mxu3 %v1733_v15  ;;  %v1966_v15 = vld [vmem:[#allocation12 + $0x80] sm:$0xff] }
  0xe0   :  { %1084 = vmatmul.bf16.vlgmr.msra.gmra.mxu1 %v2280_v62  ;;  %v1673_v62 = vor.u32 %v1928_v34, %v1672_v33  ;;  %1319 = vmatpush.bf16.msra.mxu0 %v1955_v37 }
  0xe1   :  { %1330 = vmatpush.bf16.msrb.mxu1 %v1965_v39 }
  0xe2   :  { %1095 = vmatpush.bf16.msra.mxu2 %v1589_v16 }
  0xe3   :  { %1105 = vmatpush.bf16.msrb.mxu3 %v1721_v22 }
  0xe4   :  { %1320 = vmatpush.bf16.msra.mxu0 %v1954_v38 }
  0xe5   :  { %1331 = vmatpush.bf16.msrb.mxu1 %v1964_v43 }
  0xe6   :  { %1096 = vmatpush.bf16.msra.mxu2 %v1577_v23  ;;  %1058 = vmatmul.bf16.vlgmr.msra.gmra.mxu3 %v310_v61 }
  0xe7   :  { %1106 = vmatpush.bf16.msrb.mxu3 %v1709_v26 }
  0xe9   :  { %1097 = vmatmul.bf16.vlgmr.msra.gmra.mxu2 %v2283_v19  ;;  %v1953_v19 = vld [vmem:[#allocation12 + $0x18] sm:$0xff]  ;;  %1332 = vmatpush.bf16.msrb.mxu1 %v1963_v45  ;;  %v1985_v45 = vld [vmem:[%s2310_s8] ss:$0 sm:$0xff] }
  0xea   :  { %1321 = vmatpush.bf16.msra.mxu0 %v1953_v19  ;;  %1343 = vmatpush.bf16.msrb.mxu2 %v1973_v51 }
  0xeb   :  { %1107 = vmatpush.bf16.msrb.mxu3 %v1697_v29 }
  0xed   :  { %1333 = vmatpush.bf16.msrb.mxu1 %v1962_v48 }
  0xee   :  { %1322 = vmatpush.bf16.msra.mxu0 %v1952_v42  ;;  %1344 = vmatpush.bf16.msrb.mxu2 %v1972_v20 }
  0xef   :  { %1108 = vmatpush.bf16.msrb.mxu3 %v1685_v32 }
  0xf1   :  { %1334 = vmatpush.bf16.msrb.mxu1 %v1961_v50 }
  0xf2   :  { %1323 = vmatpush.bf16.msra.mxu0 %v1951_v44  ;;  %1345 = vmatpush.bf16.msrb.mxu2 %v1971_v56 }
  0xf3   :  { %1109 = vmatpush.bf16.msrb.mxu3 %v1673_v62 }
  0xf5   :  { %1335 = vmatpush.bf16.msrb.mxu1 %v1960_v53 }
  0xf6   :  { %1110 = vmatmul.bf16.vlgmr.msrb.gmra.mxu3 %v310_v61  ;;  %1324 = vmatpush.bf16.msra.mxu0 %v1950_v47  ;;  %v439_v61 = vld [vmem:[%s2308_s6] sm:$0x7] }
  0xf7   :  { %1346 = vmatpush.bf16.msrb.mxu2 %v1970_v60  ;;  %v441_v63 = vperm.slane %v439_v61, 0  ;;  %v442_v40 = vperm.slane %v439_v61, 1  ;;  %v443_v31 = vperm.slane %v439_v61, 2 }
  0xf9   :  { %1336 = vmatpush.bf16.msrb.mxu1 %v1959_v55 }
  0xfb   :  { %1347 = vmatpush.bf16.msrb.mxu2 %v1969_v0 }
  0xfd   :  { %1337 = vmatpush.bf16.msrb.mxu1 %v1958_v59 }
  0xff   :  { %1348 = vmatpush.bf16.msrb.mxu2 %v1968_v2 }
 0x103   :  { %1349 = vmatpush.bf16.msrb.mxu2 %v1967_v8 }
 0x107   :  { %1350 = vmatpush.bf16.msrb.mxu2 %v1966_v15 }
 0x133   :  { %v968_v41 = vpop.f32.mrf.mxu0 }
 0x134   :  { %v969_v4 = vadd.f32 %v968_v41, %v441_v63 }
 0x13b   :  { %v970_v46 = vpop.f32.mrf.mxu0 }
 0x13d   :  { %v981_v49 = vpop.f32.mrf.mxu1 }
 0x13e   :  { %v982_v6 = vadd.f32 %v981_v49, %v969_v4 }
 0x143   :  { %v1020_v52 = vpop.f32.mrf.mxu0 }
 0x144   :  { %v1021_v22 = vadd.f32 %v1020_v52, %v442_v40 }
 0x145   :  { %v983_v54 = vpop.f32.mrf.mxu1 }
 0x14b   :  { %v1022_v58 = vpop.f32.mrf.mxu0 }
 0x14c   :  { %v994_v57 = vpop.f32.mrf.mxu2 }
 0x14d   :  { %v1033_v11 = vpop.f32.mrf.mxu1  ;;  %v995_v7 = vadd.f32 %v994_v57, %v982_v6 }
 0x14e   :  { %v1034_v24 = vadd.f32 %v1033_v11, %v1021_v22 }
 0x154   :  { %v996_v1 = vpop.f32.mrf.mxu2  ;;  %v1072_v3 = vpop.f32.mrf.mxu0 }
 0x155   :  { %v1035_v5 = vpop.f32.mrf.mxu1  ;;  %v1073_v34 = vadd.f32 %v1072_v3, %v443_v31 }
 0x159   :  { %v1007_v9 = vpop.f32.mrf.mxu3 }
 0x15a   :  { %v1008_v10 = vadd.f32 %v1007_v9, %v995_v7 }
 0x15c   :  { %v1046_v12 = vpop.f32.mrf.mxu2  ;;  %v1074_v13 = vpop.f32.mrf.mxu0  ;;  %v1115_v14 = vmax.f32 %v1008_v10, 0.0 }
 0x15d   :  { %v1085_v16 = vpop.f32.mrf.mxu1  ;;  %v1047_v25 = vadd.f32 %v1046_v12, %v1034_v24 }
 0x15e   :  { %v1118_v17 = vpack.c.bf16 %v1115_v14, %v1115_v14  ;;  %v1086_v62 = vadd.f32 %v1085_v16, %v1073_v34 }
 0x160   :  { %1325 = vmatmul.bf16.vlgmr.msra.gmra.mxu0 %v1118_v17 }
 0x161   :  { %v1009_v18 = vpop.f32.mrf.mxu3 }
 0x164   :  { %v1048_v21 = vpop.f32.mrf.mxu2 }
 0x165   :  { %v1087_v23 = vpop.f32.mrf.mxu1 }
 0x169   :  { %v1059_v26 = vpop.f32.mrf.mxu3 }
 0x16a   :  { %v1060_v27 = vadd.f32 %v1059_v26, %v1047_v25 }
 0x16c   :  { %v1098_v28 = vpop.f32.mrf.mxu2  ;;  %v1116_v29 = vmax.f32 %v1060_v27, 0.0 }
 0x16d   :  { %v1099_v35 = vadd.f32 %v1098_v28, %v1086_v62 }
 0x16e   :  { %v1119_v30 = vpack.c.bf16 %v1116_v29, %v1116_v29 }
 0x170   :  { %1338 = vmatmul.bf16.vlgmr.msrb.gmra.mxu1 %v1119_v30 }
 0x171   :  { %v1061_v32 = vpop.f32.mrf.mxu3 }
 0x174   :  { %v1100_v33 = vpop.f32.mrf.mxu2 }
 0x179   :  { %v1111_v36 = vpop.f32.mrf.mxu3 }
 0x17a   :  { %v1112_v37 = vadd.f32 %v1111_v36, %v1099_v35 }
 0x17c   :  { %v1117_v38 = vmax.f32 %v1112_v37, 0.0 }
 0x17e   :  { %v1120_v19 = vpack.c.bf16 %v1117_v38, %v1117_v38 }
 0x180   :  { %1351 = vmatmul.bf16.vlgmr.msrb.gmra.mxu2 %v1120_v19 }
 0x181   :  { %v1113_v39 = vpop.f32.mrf.mxu3 }
 0x1dd   :  { %v1326_v41 = vpop.f32.mrf.mxu0 }
 0x1de   :  { %v1327_v46 = vadd.f32 %v1985_v45, %v1326_v41 }
 0x1e5   :  { %v1328_v42 = vpop.f32.mrf.mxu0 }
 0x1ed   :  { %v1339_v43 = vpop.f32.mrf.mxu1 }
 0x1ee   :  { %v1340_v47 = vadd.f32 %v1339_v43, %v1327_v46 }
 0x1f5   :  { %v1341_v44 = vpop.f32.mrf.mxu1 }
 0x203   :  { %v1352_v48 = vpop.f32.mrf.mxu2 }
 0x204   :  { %v1353_v49 = vadd.f32 %v1352_v48, %v1340_v47 }
 0x206   :  { %1357 = vst.msk [vmem:[%s2311_s9] sm:$0x3] %vm1356_vm4, %v1353_v49 }
 0x20b   :  { %v1354_v50 = vpop.f32.mrf.mxu2 }
 0x20c   :  { %1362 = vsyncpa [#allocation3], 1 }
 0x20d   :  { %1363 = vsyncpa [#allocation5], 1 }
 0x20e   :  { %1364 = vsyncpa [#allocation8], 1 }
 0x20f   :  { %1365 = vsyncpa [#allocation11], 1 }

</bundles_post_ra>
